<compile_context>
chip_gen: v5e
topology: v5e:2x2
jax: 0.10.0
libtpu: 0.0.40
codegen_flags: <defaults>
</compile_context>

<pallas_src>
import functools

import jax
import jax.numpy as jnp
from jax import lax
from jax.experimental import pallas as pl
from jax.experimental.pallas import tpu as pltpu


def _crop_and_resize_kernel(box_ind_ref, order_ref, boxes_ref, image_ref,
                            out_ref, *, crop_height, crop_width,
                            extrapolation_value):
    # box_ind_ref / order_ref only drive the index_maps.
    del box_ind_ref, order_ref
    b = pl.program_id(0)
    _, C, H, W = image_ref.shape

    y1 = boxes_ref[4 * b + 0]
    x1 = boxes_ref[4 * b + 1]
    y2 = boxes_ref[4 * b + 2]
    x2 = boxes_ref[4 * b + 3]

    Hm1 = jnp.float32(H - 1)
    Wm1 = jnp.float32(W - 1)

    if crop_height > 1:
        h_scale = (y2 - y1) * Hm1 / jnp.float32(crop_height - 1)
        y_base = y1 * Hm1
    else:
        h_scale = jnp.float32(0.0)
        y_base = 0.5 * (y1 + y2) * Hm1
    if crop_width > 1:
        w_scale = (x2 - x1) * Wm1 / jnp.float32(crop_width - 1)
        x_base = x1 * Wm1
    else:
        w_scale = jnp.float32(0.0)
        x_base = 0.5 * (x1 + x2) * Wm1

    # Sample coordinates (kept 2-D for TPU layout); reused for the OOB mask.
    iy = lax.broadcasted_iota(jnp.int32, (crop_height, 1), 0).astype(jnp.float32)
    ix = lax.broadcasted_iota(jnp.int32, (1, crop_width), 1).astype(jnp.float32)
    ys = y_base + iy * h_scale                        # (crop_h, 1)
    xs = x_base + ix * w_scale                        # (1, crop_w)

    ty = jnp.floor(ys)
    ly = ys - ty
    tyi = ty.astype(jnp.int32)
    tx = jnp.floor(xs)
    lx = xs - tx
    txi = tx.astype(jnp.int32)

    # Row weights Wy: (crop_h, H) -> standard (M, K) operand of stage A.
    ry = lax.broadcasted_iota(jnp.int32, (crop_height, H), 1)
    wy = jnp.where(ry == tyi, 1.0 - ly,
                   jnp.where(ry == tyi + 1, ly, 0.0))           # f32
    # Column weights Wx built directly in (W, crop_w): plain (K, N) operand.
    rx = lax.broadcasted_iota(jnp.int32, (W, crop_width), 0)
    wx = jnp.where(rx == txi, 1.0 - lx,
                   jnp.where(rx == txi + 1, lx, 0.0))           # f32

    img = image_ref[0]                    # (C, H, W), native dtype (no f32 copy)
    cdt = img.dtype

    # Stage A: contract H, C-batched, N = W (lane-filled): -> (C, crop_h, W) f32.
    wy_b = jnp.broadcast_to(wy.astype(cdt)[None], (C, crop_height, H))
    rows = lax.dot_general(wy_b, img, (((2,), (1,)), ((0,), (0,))),
                           preferred_element_type=jnp.float32)

    # Stage B: one plain (C*crop_h, W) @ (W, crop_w) matmul; the result is
    # already in (C, crop_h, crop_w) order.  The rows reshape is layout-free
    # when crop_h is a multiple of the sublane tile (8 for f32).
    rows2 = rows.reshape(C * crop_height, W)
    out = lax.dot_general(rows2, wx, (((1,), (0,)), ((), ())),
                          preferred_element_type=jnp.float32)   # (C*crop_h, crop_w)
    out3 = out.reshape(C, crop_height, crop_width)

    # Out-of-range sample locations -> extrapolation_value.
    ooby = (ys < 0.0) | (ys > Hm1)                    # (crop_h, 1)
    oobx = (xs < 0.0) | (xs > Wm1)                    # (1, crop_w)
    oob = ooby | oobx                                 # (crop_h, crop_w)
    out3 = jnp.where(oob[None], jnp.float32(extrapolation_value), out3)

    out_ref[...] = out3[None].astype(out_ref.dtype)   # (1, C, crop_h, crop_w)


def crop_and_resize(image, boxes, box_ind, crop_height, crop_width,
                    extrapolation_value=0.0):
    """Pallas TPU implementation of CropAndResize.forward."""
    if not jnp.issubdtype(image.dtype, jnp.floating):
        # Integer images would truncate the fractional interpolation weights.
        image = image.astype(jnp.float32)
    N, C, H, W = image.shape
    nb = boxes.shape[0]
    crop_height = int(crop_height)
    crop_width = int(crop_width)
    boxes = boxes.astype(jnp.float32)
    box_ind = box_ind.astype(jnp.int32)

    # Sort boxes by image index so consecutive grid steps map to the same image
    # block (Pallas skips the repeated HBM->VMEM image DMA).  The sort
    # permutation is scalar-prefetched and used to write each box's output
    # directly to its final (unsorted) row — no wrapper un-permute pass.
    order = jnp.argsort(box_ind).astype(jnp.int32)
    box_ind_s = box_ind[order]
    boxes_s = boxes[order].reshape(-1)     # flat 1-D SMEM layout (no lane padding)

    kernel = functools.partial(
        _crop_and_resize_kernel,
        crop_height=crop_height,
        crop_width=crop_width,
        extrapolation_value=float(extrapolation_value),
    )

    # ---- VMEM budget: per-generation cap with headroom, f32 intermediates counted.
    itemsize = jnp.dtype(image.dtype).itemsize
    img_block = C * H * W * itemsize
    out_block = C * crop_height * crop_width * itemsize
    f32_interm = 4 * (C * crop_height * H      # broadcast Wy
                      + C * crop_height * W    # rows (stage A output)
                      + C * crop_height * crop_width  # f32 output tile
                      + crop_height * H + W * crop_width)  # Wy, Wx
    try:
        vmem_cap = int(pltpu.get_tpu_info().vmem_capacity_bytes)
    except Exception:
        vmem_cap = 64 << 20                 # conservative (v7x physical VMEM)
    budget = int(0.80 * vmem_cap)           # leave headroom for Mosaic scratch
    margin = 2 << 20
    need_double_buf = 2 * img_block + 2 * out_block + f32_interm + margin
    img_bufs = 2 if need_double_buf <= budget else 1
    vmem_bytes = int(min(budget,
                         max(4 << 20,
                             img_bufs * img_block + 2 * out_block
                             + f32_interm + margin)))

    image_index_map = lambda b, box_ind_ref, order_ref: (box_ind_ref[b], 0, 0, 0)
    if img_bufs == 2:
        image_spec = pl.BlockSpec((1, C, H, W), image_index_map)
    else:
        # Sorted boxes make the repeated-image prefetch a no-op; single-buffer
        # the biggest buffer instead of blowing the (v7x) VMEM budget.
        image_spec = pl.BlockSpec((1, C, H, W), image_index_map,
                                  pipeline_mode=pl.Buffered(1))

    grid_spec = pltpu.PrefetchScalarGridSpec(
        num_scalar_prefetch=2,              # box_ind (image select) + order (out slot)
        grid=(nb,),
        in_specs=[
            # boxes: flat 1-D array resident in SMEM (scalar per-box reads)
            pl.BlockSpec(memory_space=pltpu.MemorySpace.SMEM),
            image_spec,
        ],
        out_specs=pl.BlockSpec(
            (1, C, crop_height, crop_width),
            lambda b, box_ind_ref, order_ref: (order_ref[b], 0, 0, 0)),
    )

    out = pl.pallas_call(
        kernel,
        out_shape=jax.ShapeDtypeStruct((nb, C, crop_height, crop_width),
                                       image.dtype),
        grid_spec=grid_spec,
        compiler_params=pltpu.CompilerParams(
            dimension_semantics=("parallel",),   # independent boxes; 2 TCs on v7x
            vmem_limit_bytes=vmem_bytes),
    )(box_ind_s, order, boxes_s, image)
    return out


def crop_and_resize_ref(image, boxes, box_ind, crop_height, crop_width,
                        extrapolation_value=0.0):
    """Pure-JAX reference (matches the TF/CPU backend semantics)."""
    N, C, H, W = image.shape
    Hm1 = jnp.float32(H - 1)
    Wm1 = jnp.float32(W - 1)

    def one(img, box):
        y1, x1, y2, x2 = box[0], box[1], box[2], box[3]
        if crop_height > 1:
            ys = y1 * Hm1 + jnp.arange(crop_height, dtype=jnp.float32) * (
                (y2 - y1) * Hm1 / (crop_height - 1))
        else:
            ys = jnp.full((crop_height,), 0.5 * (y1 + y2) * Hm1, jnp.float32)
        if crop_width > 1:
            xs = x1 * Wm1 + jnp.arange(crop_width, dtype=jnp.float32) * (
                (x2 - x1) * Wm1 / (crop_width - 1))
        else:
            xs = jnp.full((crop_width,), 0.5 * (x1 + x2) * Wm1, jnp.float32)
        ty = jnp.floor(ys)
        ly = ys - ty
        tx = jnp.floor(xs)
        lx = xs - tx
        tyi = jnp.clip(ty, 0, H - 1).astype(jnp.int32)
        byi = jnp.clip(ty + 1, 0, H - 1).astype(jnp.int32)
        txi = jnp.clip(tx, 0, W - 1).astype(jnp.int32)
        bxi = jnp.clip(tx + 1, 0, W - 1).astype(jnp.int32)
        top = img[:, tyi, :]
        bot = img[:, byi, :]
        rows = top * (1 - ly)[None, :, None] + bot * ly[None, :, None]
        left = rows[:, :, txi]
        right = rows[:, :, bxi]
        out = left * (1 - lx)[None, None, :] + right * lx[None, None, :]
        ooby = (ys < 0) | (ys > Hm1)
        oobx = (xs < 0) | (xs > Wm1)
        mask = ooby[:, None] | oobx[None, :]
        return jnp.where(mask[None], jnp.float32(extrapolation_value), out)

    return jax.vmap(one)(image[box_ind], boxes)


if __name__ == "__main__":
    key = jax.random.PRNGKey(0)
    k1, k2, k3 = jax.random.split(key, 3)

    N, C, H, W = 2, 4, 16, 16
    num_boxes = 6
    crop_h, crop_w = 8, 8
    extrapolation_value = -1.0

    image = jax.random.normal(k1, (N, C, H, W), jnp.float32)
    # boxes slightly outside [0, 1] so the extrapolation path is exercised
    raw = jax.random.uniform(k2, (num_boxes, 4), jnp.float32,
                             minval=-0.2, maxval=1.2)
    y1 = jnp.minimum(raw[:, 0], raw[:, 2])
    y2 = jnp.maximum(raw[:, 0], raw[:, 2])
    x1 = jnp.minimum(raw[:, 1], raw[:, 3])
    x2 = jnp.maximum(raw[:, 1], raw[:, 3])
    boxes = jnp.stack([y1, x1, y2, x2], axis=1)
    box_ind = jax.random.randint(k3, (num_boxes,), 0, N, jnp.int32)

    out = crop_and_resize(image, boxes, box_ind, crop_h, crop_w,
                          extrapolation_value)
    out = jax.block_until_ready(out)

    ref = crop_and_resize_ref(image, boxes, box_ind, crop_h, crop_w,
                              extrapolation_value)
    assert out.shape == (num_boxes, C, crop_h, crop_w), out.shape
    assert jnp.allclose(out, ref, atol=1e-4, rtol=1e-4), \
        float(jnp.max(jnp.abs(out - ref)))
    print("KERNEL_OK")
</pallas_src>

<mosaic_0001>
module attributes {stable_mosaic.version = 11 : i64} {
  func.func @_crop_and_resize_kernel(%arg0: i32, %arg1: memref<6xi32, #tpu.memory_space<smem>>, %arg2: memref<6xi32, #tpu.memory_space<smem>>, %arg3: memref<24xf32, #tpu.memory_space<smem>>, %arg4: memref<1x4x16x16xf32, #tpu.memory_space<vmem>>, %arg5: memref<1x4x8x8xf32, #tpu.memory_space<vmem>>) attributes {dimension_semantics = [#tpu.dimension_semantics<parallel>], iteration_bounds = array<i64: 6>, scalar_prefetch = 2 : i64, scratch_operands = 0 : i64, tpu.core_type = #tpu.core_type<tc>, window_params = [{transform_indices = @transform_0, window_bounds = array<i64: 24>}, {transform_indices = @transform_1, window_bounds = array<i64: 1, 4, 16, 16>}, {transform_indices = @transform_2, window_bounds = array<i64: 1, 4, 8, 8>}]} {
    %c4_i32 = arith.constant 4 : i32
    %0 = arith.muli %c4_i32, %arg0 : i32
    %c0_i32 = arith.constant 0 : i32
    %1 = arith.addi %0, %c0_i32 : i32
    %2 = arith.index_cast %1 : i32 to index
    %3 = memref.load %arg3[%2] : memref<24xf32, #tpu.memory_space<smem>>
    %c4_i32_0 = arith.constant 4 : i32
    %4 = arith.muli %c4_i32_0, %arg0 : i32
    %c1_i32 = arith.constant 1 : i32
    %5 = arith.addi %4, %c1_i32 : i32
    %6 = arith.index_cast %5 : i32 to index
    %7 = memref.load %arg3[%6] : memref<24xf32, #tpu.memory_space<smem>>
    %c4_i32_1 = arith.constant 4 : i32
    %8 = arith.muli %c4_i32_1, %arg0 : i32
    %c2_i32 = arith.constant 2 : i32
    %9 = arith.addi %8, %c2_i32 : i32
    %10 = arith.index_cast %9 : i32 to index
    %11 = memref.load %arg3[%10] : memref<24xf32, #tpu.memory_space<smem>>
    %c4_i32_2 = arith.constant 4 : i32
    %12 = arith.muli %c4_i32_2, %arg0 : i32
    %c3_i32 = arith.constant 3 : i32
    %13 = arith.addi %12, %c3_i32 : i32
    %14 = arith.index_cast %13 : i32 to index
    %15 = memref.load %arg3[%14] : memref<24xf32, #tpu.memory_space<smem>>
    %16 = arith.subf %11, %3 : f32
    %cst = arith.constant 1.500000e+01 : f32
    %17 = arith.mulf %16, %cst : f32
    %cst_3 = arith.constant 7.000000e+00 : f32
    %18 = arith.divf %17, %cst_3 : f32
    %cst_4 = arith.constant 1.500000e+01 : f32
    %19 = arith.mulf %3, %cst_4 : f32
    %20 = arith.subf %15, %7 : f32
    %cst_5 = arith.constant 1.500000e+01 : f32
    %21 = arith.mulf %20, %cst_5 : f32
    %cst_6 = arith.constant 7.000000e+00 : f32
    %22 = arith.divf %21, %cst_6 : f32
    %cst_7 = arith.constant 1.500000e+01 : f32
    %23 = arith.mulf %7, %cst_7 : f32
    %24 = tpu.iota {dimensions = array<i32: 0>} : vector<8x1xi32>
    %25 = arith.sitofp %24 : vector<8x1xi32> to vector<8x1xf32>
    %26 = tpu.iota {dimensions = array<i32: 1>} : vector<1x8xi32>
    %27 = arith.sitofp %26 : vector<1x8xi32> to vector<1x8xf32>
    %28 = vector.broadcast %18 : f32 to vector<8x1xf32>
    %29 = arith.mulf %25, %28 : vector<8x1xf32>
    %30 = vector.broadcast %19 : f32 to vector<8x1xf32>
    %31 = arith.addf %30, %29 : vector<8x1xf32>
    %32 = vector.broadcast %22 : f32 to vector<1x8xf32>
    %33 = arith.mulf %27, %32 : vector<1x8xf32>
    %34 = vector.broadcast %23 : f32 to vector<1x8xf32>
    %35 = arith.addf %34, %33 : vector<1x8xf32>
    %36 = math.floor %31 : vector<8x1xf32>
    %37 = arith.subf %31, %36 : vector<8x1xf32>
    %38 = arith.fptosi %36 : vector<8x1xf32> to vector<8x1xi32>
    %39 = math.floor %35 : vector<1x8xf32>
    %40 = arith.subf %35, %39 : vector<1x8xf32>
    %41 = arith.fptosi %39 : vector<1x8xf32> to vector<1x8xi32>
    %42 = tpu.iota {dimensions = array<i32: 1>} : vector<8x16xi32>
    %43 = vector.broadcast %38 : vector<8x1xi32> to vector<8x16xi32>
    %44 = arith.cmpi eq, %42, %43 : vector<8x16xi32>
    %cst_8 = arith.constant 1.000000e+00 : f32
    %45 = vector.broadcast %cst_8 : f32 to vector<8x1xf32>
    %46 = arith.subf %45, %37 : vector<8x1xf32>
    %c1_i32_9 = arith.constant 1 : i32
    %47 = vector.broadcast %c1_i32_9 : i32 to vector<8x1xi32>
    %48 = arith.addi %38, %47 : vector<8x1xi32>
    %49 = vector.broadcast %48 : vector<8x1xi32> to vector<8x16xi32>
    %50 = arith.cmpi eq, %42, %49 : vector<8x16xi32>
    %cst_10 = arith.constant 0.000000e+00 : f32
    %51 = vector.shape_cast %37 : vector<8x1xf32> to vector<8x1xf32>
    %52 = vector.broadcast %51 : vector<8x1xf32> to vector<8x16xf32>
    %53 = vector.broadcast %cst_10 : f32 to vector<8x16xf32>
    %54 = arith.select %50, %52, %53 : vector<8x16xi1>, vector<8x16xf32>
    %55 = vector.shape_cast %46 : vector<8x1xf32> to vector<8x1xf32>
    %56 = vector.broadcast %55 : vector<8x1xf32> to vector<8x16xf32>
    %57 = arith.select %44, %56, %54 : vector<8x16xi1>, vector<8x16xf32>
    %58 = tpu.iota {dimensions = array<i32: 0>} : vector<16x8xi32>
    %59 = vector.broadcast %41 : vector<1x8xi32> to vector<16x8xi32>
    %60 = arith.cmpi eq, %58, %59 : vector<16x8xi32>
    %cst_11 = arith.constant 1.000000e+00 : f32
    %61 = vector.broadcast %cst_11 : f32 to vector<1x8xf32>
    %62 = arith.subf %61, %40 : vector<1x8xf32>
    %c1_i32_12 = arith.constant 1 : i32
    %63 = vector.broadcast %c1_i32_12 : i32 to vector<1x8xi32>
    %64 = arith.addi %41, %63 : vector<1x8xi32>
    %65 = vector.broadcast %64 : vector<1x8xi32> to vector<16x8xi32>
    %66 = arith.cmpi eq, %58, %65 : vector<16x8xi32>
    %cst_13 = arith.constant 0.000000e+00 : f32
    %67 = vector.shape_cast %40 : vector<1x8xf32> to vector<1x8xf32>
    %68 = vector.broadcast %67 : vector<1x8xf32> to vector<16x8xf32>
    %69 = vector.broadcast %cst_13 : f32 to vector<16x8xf32>
    %70 = arith.select %66, %68, %69 : vector<16x8xi1>, vector<16x8xf32>
    %71 = vector.shape_cast %62 : vector<1x8xf32> to vector<1x8xf32>
    %72 = vector.broadcast %71 : vector<1x8xf32> to vector<16x8xf32>
    %73 = arith.select %60, %72, %70 : vector<16x8xi1>, vector<16x8xf32>
    %c0 = arith.constant 0 : index
    %c0_14 = arith.constant 0 : index
    %c0_15 = arith.constant 0 : index
    %c0_16 = arith.constant 0 : index
    %74 = vector.load %arg4[%c0, %c0_14, %c0_15, %c0_16] : memref<1x4x16x16xf32, #tpu.memory_space<vmem>>, vector<1x4x16x16xf32>
    %75 = vector.shape_cast %74 : vector<1x4x16x16xf32> to vector<4x16x16xf32>
    %76 = vector.shape_cast %57 : vector<8x16xf32> to vector<1x8x16xf32>
    %77 = vector.shape_cast %76 : vector<1x8x16xf32> to vector<1x8x16xf32>
    %78 = vector.broadcast %77 : vector<1x8x16xf32> to vector<4x8x16xf32>
    %cst_17 = arith.constant dense<0.000000e+00> : vector<4x8x16xf32>
    %79 = tpu.matmul %78, %75, %cst_17 {dimension_numbers = #tpu.dot_dimension_numbers<[2], [1], [1], [2], [0, 0, 0, 1, 1, 2], [0], [0]>} : vector<4x8x16xf32>, vector<4x16x16xf32>, vector<4x8x16xf32> -> vector<4x8x16xf32>
    %80 = vector.shape_cast %79 : vector<4x8x16xf32> to vector<32x16xf32>
    %cst_18 = arith.constant dense<0.000000e+00> : vector<32x8xf32>
    %81 = tpu.matmul %80, %73, %cst_18 {dimension_numbers = #tpu.dot_dimension_numbers<[1], [0], [0], [1], [0, 0, 1, 1], [], []>} : vector<32x16xf32>, vector<16x8xf32>, vector<32x8xf32> -> vector<32x8xf32>
    %82 = vector.shape_cast %81 : vector<32x8xf32> to vector<4x8x8xf32>
    %cst_19 = arith.constant 0.000000e+00 : f32
    %83 = vector.broadcast %cst_19 : f32 to vector<8x1xf32>
    %84 = arith.cmpf olt, %31, %83 : vector<8x1xf32>
    %cst_20 = arith.constant 1.500000e+01 : f32
    %85 = vector.broadcast %cst_20 : f32 to vector<8x1xf32>
    %86 = arith.cmpf ogt, %31, %85 : vector<8x1xf32>
    %87 = arith.ori %84, %86 : vector<8x1xi1>
    %cst_21 = arith.constant 0.000000e+00 : f32
    %88 = vector.broadcast %cst_21 : f32 to vector<1x8xf32>
    %89 = arith.cmpf olt, %35, %88 : vector<1x8xf32>
    %cst_22 = arith.constant 1.500000e+01 : f32
    %90 = vector.broadcast %cst_22 : f32 to vector<1x8xf32>
    %91 = arith.cmpf ogt, %35, %90 : vector<1x8xf32>
    %92 = arith.ori %89, %91 : vector<1x8xi1>
    %93 = vector.broadcast %87 : vector<8x1xi1> to vector<8x8xi1>
    %94 = vector.broadcast %92 : vector<1x8xi1> to vector<8x8xi1>
    %95 = arith.ori %93, %94 : vector<8x8xi1>
    %96 = vector.shape_cast %95 : vector<8x8xi1> to vector<1x8x8xi1>
    %cst_23 = arith.constant -1.000000e+00 : f32
    %97 = vector.shape_cast %96 : vector<1x8x8xi1> to vector<1x8x8xi1>
    %98 = vector.broadcast %97 : vector<1x8x8xi1> to vector<4x8x8xi1>
    %99 = vector.broadcast %cst_23 : f32 to vector<4x8x8xf32>
    %100 = arith.select %98, %99, %82 : vector<4x8x8xi1>, vector<4x8x8xf32>
    %101 = vector.shape_cast %100 : vector<4x8x8xf32> to vector<1x4x8x8xf32>
    %c0_24 = arith.constant 0 : index
    %c0_25 = arith.constant 0 : index
    %c0_26 = arith.constant 0 : index
    %c0_27 = arith.constant 0 : index
    %102 = vector.load %arg5[%c0_24, %c0_25, %c0_26, %c0_27] : memref<1x4x8x8xf32, #tpu.memory_space<vmem>>, vector<1x4x8x8xf32>
    tpu.vector_store %arg5[%c0_24, %c0_25, %c0_26, %c0_27], %101 {strides = array<i32>} : memref<1x4x8x8xf32, #tpu.memory_space<vmem>>, vector<1x4x8x8xf32>,
    return
  }
  func.func @transform_0(%arg0: i32, %arg1: memref<6xi32, #tpu.memory_space<smem>>, %arg2: memref<6xi32, #tpu.memory_space<smem>>) -> i32 {
    %c0_i32 = arith.constant 0 : i32
    %c0_i32_0 = arith.constant 0 : i32
    return %c0_i32 : i32
  }
  func.func @transform_1(%arg0: i32, %arg1: memref<6xi32, #tpu.memory_space<smem>>, %arg2: memref<6xi32, #tpu.memory_space<smem>>) -> (i32, i32, i32, i32) {
    %0 = arith.index_cast %arg0 : i32 to index
    %1 = memref.load %arg1[%0] : memref<6xi32, #tpu.memory_space<smem>>
    %c0_i32 = arith.constant 0 : i32
    %c0_i32_0 = arith.constant 0 : i32
    %c0_i32_1 = arith.constant 0 : i32
    %c0_i32_2 = arith.constant 0 : i32
    return %1, %c0_i32, %c0_i32_0, %c0_i32_1 : i32, i32, i32, i32
  }
  func.func @transform_2(%arg0: i32, %arg1: memref<6xi32, #tpu.memory_space<smem>>, %arg2: memref<6xi32, #tpu.memory_space<smem>>) -> (i32, i32, i32, i32) {
    %0 = arith.index_cast %arg0 : i32 to index
    %1 = memref.load %arg2[%0] : memref<6xi32, #tpu.memory_space<smem>>
    %c0_i32 = arith.constant 0 : i32
    %c0_i32_0 = arith.constant 0 : i32
    %c0_i32_1 = arith.constant 0 : i32
    %c0_i32_2 = arith.constant 0 : i32
    return %1, %c0_i32, %c0_i32_0, %c0_i32_1 : i32, i32, i32, i32
  }
}

</mosaic_0001>

<bundles_post_ra>
// kernel: tpu_custom_call.1
= control target key start
LH: loop header
LB: loop body
LE: loop exit
PB: predicated region body
PF: predicated region fallthrough
CT: control target
= control target key end

     0   :  { %s824_s21 = smov [#allocation3]   ;;  %s825_s22 = smov [#allocation4]   ;;  %s1082_s0 = inlined_call_operand.hbm [shape: s32[6], index: 0, kind: input, shape index: {}]   ;;  %s1083_s2 = inlined_call_operand.vmem [shape: f32[24], index: 2, kind: input, shape index: {}]   ;;  %s1084_s3 = inlined_call_operand.hbm [shape: f32[2,4,16,16], index: 3, kind: input, shape index: {}]   ;;  %s1085_s4 = inlined_call_operand.hbm [shape: f32[6,4,8,8], index: 4, kind: output, shape index: {}]   ;;  %s1086_s1 = inlined_call_operand.hbm [shape: s32[6], index: 1, kind: input, shape index: {}]  }
   0x1   :  { %1089 = sst [smem:[#allocation20_spill]] %s1083_s2  ;;  %s10_s17 = sshll.u32 %s1082_s0, 4  ;;  %s11_s17 = int_to_ptr.hbm [resolvable:$true] %s10_s17 }
   0x2   :  { %s15_s20 = sshll.u32 %s1086_s1, 4  ;;  %s16_s20 = int_to_ptr.hbm [resolvable:$true] %s15_s20 }
   0x3   :  { %13 = dma.hbm_to_smem %s11_s17, 16, %s824_s21, [#allocation2] }
   0x4   :  { %18 = dma.hbm_to_smem %s16_s20, 16, %s825_s22, [#allocation2] }
   0x5   :  { %782 = dma.done.wait [#allocation2], 32 }
   0x6   :  { %783 = vsyncadd [#allocation2], 4294967264 }
   0x7   :  { %21 = sfence }
   0x8   :  { %22 = vsyncpa [#allocation8], 0 }
   0x9   :  { %23 = vsyncpa [#allocation6], 0 }
   0xa   :  { %25 = vsyncpa [#allocation6 + $0x1], 0 }
   0xb   :  { %26 = vsyncpa [#allocation7], 0 }
   0xc   :  { %28 = vsyncpa [#allocation7 + $0x1], 0  ;;  %s863_s23 = smov 0   ;;  %s865_s0 = smov 0  }
   0xd   :  { %s867_s24 = smov 0   ;;  %s869_s1 = smov 0  }
   0xe   :  { %s871_s25 = smov 0   ;;  %s873_s26 = smov 0  }
   0xf   :  { %s875_s27 = smov 0  }
  0x10 LB: > { %1090 = sst [smem:[#allocation18_spill]] %s818_s26  ;;  %s897_s28 = sadd.s32 4294967295, %s822_s27   ;;  %s822_s27 = sphi %s875_s27, %s1111_s27   ;;  %s818_s26 = sphi %s873_s26, %s1105_s26   ;;  %s814_s25 = sphi %s871_s25, %s1110_s25   ;;  %s810_s1 = sphi %s869_s1, %s1109_s1   ;;  %s806_s24 = sphi %s867_s24, %s1108_s24   ;;  %s802_s0 = sphi %s865_s0, %s1107_s0   ;;  %s798_s23 = sphi %s863_s23, %s1106_s23  }
  0x11   : > { %s900_s29 = sadd.s32 1, %s822_s27   ;;  %s59_s30 = sld [smem:[#allocation3 + %s822_s27]] }
  0x12   : > { %s526_s5 = sadd.s32 4294967294, %s822_s27   ;;  %s60_s6 = sld [smem:[#allocation3 + %s900_s29]] }
  0x13   : > { %s64_s7 = sadd.s32 1, %s818_s26  ;;  %p71_p0 = scmp.ne.s32.totalorder %s818_s26, %s814_s25 }
  0x14   : > { %p77_p1 = scmp.ne.s32.totalorder %s814_s25, %s810_s1  ;;  %p1087_p2 = scmp.eq.s32.totalorder %s897_s28, 0 }
  0x15   : > { %p72_p3 = scmp.eq.s32.totalorder %s822_s27, 0  ;;  %s87_s8 = sld [smem:[#allocation4 + %s822_s27]] }
  0x16   : > { %p914_p4 = por %p1087_p2, %p77_p1  ;;  %s88_s10 = sld [smem:[#allocation4 + %s900_s29]] }
  0x17   : > { %s92_s11 = sadd.s32 1, %s806_s24  ;;  %p102_p5 = scmp.ne.s32.totalorder %s806_s24, %s802_s0 }
  0x18   : > { %s61_s12 = ssub.s32 %s59_s30, %s60_s6  ;;  %p103_p6 = scmp.eq.s32.totalorder %s897_s28, 5 }
  0x19   : > { %p62_p7 = scmp.eq.s32.totalorder %s61_s12, 0  ;;  %p108_p8 = scmp.ne.s32.totalorder %s802_s0, %s798_s23 }
  0x1a   : > { %p925_p9 = por %p103_p6, %p102_p5  ;;  %p109_p10 = scmp.eq.s32.totalorder %s526_s5, 5 }
  0x1b   : > { %s930_s14 = scalar_select %p62_p7, %s818_s26, %s64_s7  }
  0x1c   : > { %s89_s15 = ssub.s32 %s87_s8, %s88_s10  ;;  %p932_p11 = por %p109_p10, %p108_p8 }
  0x1d   : > { %1093 = sst [smem:[#allocation19_spill]] %s930_s14  ;;  %p90_p12 = scmp.eq.s32.totalorder %s89_s15, 0 }
  0x1e   : > { %p527_p13 = scmp.ge.s32.totalorder %s822_s27, 1  ;;  %p116_p1 = scmp.lt.s32.totalorder %s822_s27, 7 }
  0x1f   : > { %s939_s17 = scalar_select %p90_p12, %s806_s24, %s92_s11  }
  0x20   : > { %p941_p2 = pnand %p527_p13, %p116_p1  ;;  %s1096_s2 = sld [smem:[#allocation20_spill]] }
  0x21   : > { %p953_p5 = por %p72_p3, %p71_p0  ;;  %s139_s1 = sand.u32 1, %s818_s26  }
  0x22   : > { %p573_p6 = pneg %p941_p2  ;;  %p1098_p7 = scmp.eq.s32.totalorder %s897_s28, 0 }
  0x23   : > { %p588_p10 = scmp.lt.s32.totalorder %s822_s27, 6  ;;  %s530_s30 = sshll.u32 %s139_s1, 6 }
  0x24   : > { %p574_p8 = pnand %p573_p6, %p1098_p7  ;;  %s826_s6 = smov [#allocation5]  }
  0x25   : > { %p965_p12 = pnand %p588_p10, %p953_p5  ;;  %s143_s11 = scalar_lea.vmem [#allocation9], %s530_s30 }
  0x26   : > { %s128_s21 = sshll.u32 %s1096_s2, 4  ;;  %s152_s12 = sshll.u32 %s143_s11, 4  ;;  %s129_s21 = int_to_ptr.vmem [resolvable:$true] %s128_s21  ;;  %s153_s12 = int_to_ptr.vmem [resolvable:$true] %s152_s12 }
  0x27   : > { %576 = dma.vmem_to_smem (!%p574_p8), %s129_s21, 16, %s826_s6, [#allocation8]  }
  0x28   : > { %s563_s7 = scalar_select %p953_p5, [#allocation3], [#allocation11] }
  0x29   : > { %s564_s8 = scalar_select %p953_p5, %s822_s27, 0 }
  0x2a   : > { %s1113_s7 = smov (!%p588_p10, %s563_s7), [#allocation13]  ;;  %s140_s26 = scalar_lea.sflag [#allocation6], %s139_s1 }
  0x2b   : > { %s1115_s8 = smov (!%p588_p10, %s564_s8), 0  ;;  %p700_p3 = pneg %p965_p12 }
  0x2c   : > { %s144_s10 = sld [smem:[%s1113_s7 + %s1115_s8]]  ;;  %s703_s7 = scalar_lea.hbm %s1084_s3, 128 }
  0x32   : > { %s551_s15 = sshll.u32 %s144_s10, 6 }
  0x33   : > { %s149_s2 = scalar_lea.hbm %s1084_s3, %s551_s15 }
  0x34   : > { %s150_s14 = sshll.u32 %s149_s2, 4  ;;  %s151_s14 = int_to_ptr.hbm [resolvable:$true] %s150_s14 }
  0x35   : > { %s696_s21 = sshra.s32 %s151_s14, 4  ;;  %s697_s21 = int_to_ptr.hbm [resolvable:$true] %s696_s21 }
  0x36   : > { %s698_s6 = scalar_lea.hbm %s697_s21, 64  ;;  %p704_p5 = scmp.lt.s32.totalorder %s697_s21, %s1084_s3 }
  0x37   : > { %p699_p0 = scmp.ne.s32.totalorder %s697_s21, %s698_s6  ;;  %p705_p6 = scmp.lt.s32.totalorder %s703_s7, %s698_s6 }
  0x39   : > { %p701_p13 = pnand %p700_p3, %p699_p0  ;;  %p706_p7 = por %p705_p6, %p704_p5 }
  0x3b   : > { %p702_p1 = pneg %p701_p13 }
  0x3d   : > { %p707_p8 = pnand %p706_p7, %p702_p1 }
  0x3f   : > { %710 = shalt.err (!%p707_p8)
}
  0x40   : > { %s827_s2 = smov 128   ;;  %s828_s1 = smov 8  }
  0x41   : > { %582 = dma.hbm_to_vmem [thread:$0]  (!%p965_p12), %s151_s14, 1024, %s153_s12, %s140_s26, %s827_s2, %s827_s2, %s828_s1  }
  0x42   : > { %164 = sbr.rel (%p941_p2) target bundleno = 438 (0x1b6), region = 28  ;;  %p1100_p10 = scmp.eq.s32.totalorder (!%p941_p2), %s897_s28, 0 }
  0x47   : > { %785 = dma.done.wait (%p1100_p10), [#allocation8], 16   ;;  %p1101_p0 = pmov %p1100_p10 }
  0x48   : > { %s171_s11 = sand.u32 1, %s814_s25  }
  0x49   : > { %787 = vsyncadd (%p1101_p0), [#allocation8], 4294967280  ;;  %s535_s15 = sshll.u32 %s171_s11, 6  ;;  %s172_s19 = scalar_lea.sflag [#allocation6], %s171_s11 }
  0x4a   : > { %s994_s20 = scalar_lea.vmem [#allocation9], %s535_s15 }
  0x4b   : > { %789 = dma.done.wait (%p914_p4), %s172_s19, 1024  }
  0x4c   : > { %791 = vsyncadd (%p914_p4), %s172_s19, 4294966272 }
  0x4d   : > { %181 = sfence }
  0x4e   : > { %v829_v0 = vmov 7.0   ;;  %v270_v7 = vld [vmem:[%s994_s20 + $0x8] sm:$0xff]  ;;  %v269_v9 = vld [vmem:[%s994_s20] sm:$0xff]  ;;  %s537_s26 = sshll.u32 %s897_s28, 2  ;;  %v276_v11 = vld [vmem:[%s994_s20 + $0x38] sm:$0xff]  ;;  %v232_v15 = vlaneseq  ;;  %vm277_vm10 = vcmask 130048  }
  0x4f   : > { %655 = vrcp.f32 %v829_v0  ;;  %v274_v8 = vld [vmem:[%s994_s20 + $0x28] sm:$0xff]  ;;  %295 = vmatpush.msra.mxu1 %v270_v7  ;;  %v273_v10 = vld [vmem:[%s994_s20 + $0x20] sm:$0xff]  ;;  %s202_s9 = sadd.s32 1, %s537_s26  ;;  %s204_s14 = sadd.s32 2, %s537_s26  ;;  %v275_v12 = vld [vmem:[%s994_s20 + $0x30] sm:$0xff]  ;;  %vm419_vm15 = vcmask 64512  }
  0x50   : > { %335 = vmatpush.msra.mxu3 %v274_v8  ;;  %s201_s18 = sld [smem:[#allocation5 + %s537_s26]]  ;;  %s206_s5 = sadd.s32 3, %s537_s26  ;;  %v272_v13 = vld [vmem:[%s994_s20 + $0x18] sm:$0xff]  ;;  %v271_v14 = vld [vmem:[%s994_s20 + $0x10] sm:$0xff]  ;;  %v233_v16 = vshrl.u32 %v232_v15, 7  ;;  %v236_v17 = vand.u32 127, %v232_v15 }
  0x51   : > { %296 = vmatpush.msra.mxu1 %v269_v9  ;;  %s1005_s12 = sld [smem:[#allocation5 + %s202_s9]]  ;;  %s195_s19 = sand.u32 1, %s802_s0  }
  0x52   : > { %336 = vmatpush.msra.mxu3 %v273_v10  ;;  %s205_s21 = sld [smem:[#allocation5 + %s204_s14]]  ;;  %v234_v18 = vcvt.s32.f32 %v233_v16  ;;  %v237_v19 = vcvt.s32.f32 %v236_v17  ;;  %v258_v36 = vadd.s32 8, %v233_v16  ;;  %s536_s20 = sshll.u32 %s195_s19, 5 }
  0x53   : > { %s207_s6 = sld [smem:[#allocation5 + %s206_s5]]  ;;  %315 = vmatpush.msrb.mxu1 %v272_v13  ;;  %s1117_s28 = smov (!%p925_p9, %s897_s28), 0 }
  0x54   : > { %355 = vmatpush.msrb.mxu3 %v276_v11  ;;  %s569_s26 = scalar_select %p925_p9, [#allocation4], [#allocation12] }
  0x55   : > { %v656_v1 = vpop.eup %655  ;;  %316 = vmatpush.msrb.mxu1 %v271_v14  ;;  %s197_s9 = scalar_lea.vmem [#allocation10], %s536_s20 }
  0x56   : > { %v211_v2 = vmul.f32 7.0, %v656_v1  ;;  %vm215_vm0 = vweird.f32 %v656_v1  ;;  %356 = vmatpush.msrb.mxu3 %v275_v12  ;;  %s219_s10 = smul.f32 15.0, %s201_s18  ;;  %s432_s14 = sld [smem:[%s569_s26 + %s1117_s28]] }
  0x57   : > { %s231_s1 = smul.f32 15.0, %s1005_s12 }
  0x58   : > { %v212_v3 = vsub.f32 1.0, %v211_v2  ;;  %s208_s22 = ssub.f32 %s205_s21, %s201_s18  ;;  %v240_v21 = vstv %s219_s10 }
  0x59   : > { %s220_s30 = ssub.f32 %s207_s6, %s1005_s12  ;;  %v244_v24 = vstv %s231_s1  ;;  %s438_s6 = sshll.u32 %s197_s9, 4  ;;  %s439_s6 = int_to_ptr.vmem [resolvable:$true] %s438_s6 }
  0x5a   : > { %v213_v4 = vmul.f32 %v656_v1, %v212_v3  ;;  %s209_s7 = smul.f32 15.0, %s208_s22  ;;  %s425_s22 = scalar_lea.sflag [#allocation7], %s195_s19 }
  0x5b   : > { %s221_s8 = smul.f32 15.0, %s220_s30 }
  0x5c   : > { %v214_v5 = vadd.f32 %v656_v1, %v213_v4  ;;  %s552_s18 = sshll.u32 %s432_s14, 5 }
  0x5d   : > { %s437_s21 = scalar_lea.hbm %s1085_s4, %s552_s18 }
  0x5e   : > { %v216_v6 = vsel %vm215_vm0, %v656_v1, %v214_v5  ;;  %s440_s28 = sshll.u32 %s437_s21, 4  ;;  %s441_s28 = int_to_ptr.hbm [resolvable:$true] %s440_s28 }
  0x5f   : > { %555 = vpush %v216_v6  ;;  %s740_s30 = sshra.s32 %s441_s28, 4  ;;  %s741_s30 = int_to_ptr.hbm [resolvable:$true] %s740_s30 }
  0x60   : > { %p747_p3 = scmp.lt.s32.totalorder %s741_s30, %s1085_s4 }
  0x90   : > { %s556_s2 = spop %555 }
  0x91   : > { %s218_s11 = smul.f32 %s556_s2, %s209_s7  ;;  %s742_s7 = scalar_lea.hbm %s741_s30, 32 }
  0x92   : > { %s230_s15 = smul.f32 %s556_s2, %s221_s8  ;;  %p743_p2 = scmp.ne.s32.totalorder %s741_s30, %s742_s7 }
  0x93   : > { %v238_v20 = vstv %s218_s11  ;;  %s746_s2 = scalar_lea.hbm %s1085_s4, 192 }
  0x94   : > { %v239_v22 = vmul.f32 %v238_v20, %v234_v18  ;;  %v242_v23 = vstv %s230_s15  ;;  %p744_p4 = pnand %p743_p2, %p925_p9  ;;  %p748_p13 = scmp.lt.s32.totalorder %s746_s2, %s742_s7 }
  0x95   : > { %v243_v25 = vmul.f32 %v242_v23, %v237_v19 }
  0x96   : > { %v241_v26 = vadd.f32 %v240_v21, %v239_v22  ;;  %p745_p12 = pneg %p744_p4  ;;  %p749_p1 = por %p748_p13, %p747_p3 }
  0x97   : > { %v245_v27 = vadd.f32 %v244_v24, %v243_v25 }
  0x98   : > { %v246_v28 = vfloor.f32 %v241_v26  ;;  %vm402_vm1 = vcmp.lt.f32.partialorder %v241_v26, 0.0  ;;  %vm403_vm2 = vcmp.gt.f32.partialorder %v241_v26, 15.0  ;;  %p750_p5 = pnand %p749_p1, %p745_p12 }
  0x99   : > { %v249_v29 = vfloor.f32 %v245_v27  ;;  %vm404_vm3 = vmor %vm402_vm1, %vm403_vm2  ;;  %vm405_vm4 = vcmp.lt.f32.partialorder %v245_v27, 0.0  ;;  %vm406_vm5 = vcmp.gt.f32.partialorder %v245_v27, 15.0 }
  0x9a   : > { %v247_v30 = vsub.f32 %v241_v26, %v246_v28  ;;  %v558_v31 = vcvt.f32.s32 %v246_v28  ;;  %vm407_vm6 = vmor %vm405_vm4, %vm406_vm5 }
  0x9b   : > { %v250_v32 = vsub.f32 %v245_v27, %v249_v29  ;;  %v560_v33 = vcvt.f32.s32 %v249_v29  ;;  %vm1013_vm7 = vmor %vm404_vm3, %vm407_vm6 }
  0x9c   : > { %v254_v35 = vadd.s32 1, %v558_v31  ;;  %vm252_vm8 = vcmp.eq.s32.totalorder %v236_v17, %v558_v31  ;;  %v253_v38 = vsub.f32 1.0, %v247_v30 }
  0x9d   : > { %v262_v37 = vadd.s32 1, %v560_v33  ;;  %v261_v40 = vsub.f32 1.0, %v250_v32  ;;  %vm260_vm13 = vcmp.eq.s32.totalorder %v258_v36, %v560_v33  ;;  %vm259_vm14 = vcmp.eq.s32.totalorder %v233_v16, %v560_v33 }
  0x9e   : > { %vm255_vm9 = vcmp.eq.s32.totalorder %v236_v17, %v254_v35 }
  0x9f   : > { %v256_v39 = vsel %vm255_vm9, %v247_v30, 0.0  ;;  %vm264_vm11 = vcmp.eq.s32.totalorder %v258_v36, %v262_v37  ;;  %vm263_vm12 = vcmp.eq.s32.totalorder %v233_v16, %v262_v37 }
  0xa0   : > { %v257_v41 = vsel %vm252_vm8, %v253_v38, %v256_v39  ;;  %v266_v42 = vsel %vm264_vm11, %v250_v32, 0.0  ;;  %v265_v43 = vsel %vm263_vm12, %v250_v32, 0.0 }
  0xa1   : > { %538 = vmatmul.msk.f32.vlgmr.msra.gmra.mxu1 %vm277_vm10, %v257_v41  ;;  %540 = vmatmul.msk.f32.vlgmr.msra.gmra.mxu3 %vm277_vm10, %v257_v41  ;;  %v268_v44 = vsel %vm260_vm13, %v261_v40, %v266_v42  ;;  %v267_v45 = vsel %vm259_vm14, %v261_v40, %v265_v43 }
  0xa2   : > { %387 = vmatpush.msra.mxu0 %v268_v44  ;;  %553 = vmatpush.msra.mxu2 %v268_v44 }
  0xa4   : > { %388 = vmatpush.msra.mxu0 %v267_v45  ;;  %554 = vmatpush.msra.mxu2 %v267_v45 }
  0xa9   : > { %539 = vmatmul.msk.f32.vlgmr.msrb.gmra.mxu1 %vm277_vm10, %v257_v41  ;;  %541 = vmatmul.msk.f32.vlgmr.msrb.gmra.mxu3 %vm277_vm10, %v257_v41 }
 0x11e   : > { %v298_v46 = vpop.f32.mrf.mxu1 }
 0x11f   : > { %542 = vmatmul.msk.f32.vlgmr.msra.gmra.mxu0 %vm277_vm10, %v298_v46 }
 0x124   : > { %v338_v47 = vpop.f32.mrf.mxu3 }
 0x125   : > { %544 = vmatmul.msk.f32.vlgmr.msra.gmra.mxu2 %vm277_vm10, %v338_v47 }
 0x126   : > { %v318_v48 = vpop.f32.mrf.mxu1 }
 0x127   : > { %543 = vmatmul.msk.f32.gmra.mxu0 %vm277_vm10, %v318_v48 }
 0x12c   : > { %v358_v49 = vpop.f32.mrf.mxu3 }
 0x12d   : > { %545 = vmatmul.msk.f32.gmra.mxu2 %vm277_vm10, %v358_v49 }
 0x19c   : > { %v390_v50 = vpop.f32.mrf.mxu0 }
 0x19d   : > { %v415_v51 = vsel %vm1013_vm7, -1.0, %v390_v50 }
 0x19e   : > { %420 = vst.msk [vmem:[%s197_s9] sm:$0xff] %vm419_vm15, %v415_v51 }
 0x1a4   : > { %v393_v52 = vpop.f32.mrf.mxu0 }
 0x1a5   : > { %v416_v53 = vsel %vm1013_vm7, -1.0, %v393_v52 }
 0x1a6   : > { %421 = vst.msk [vmem:[%s197_s9 + $0x8] sm:$0xff] %vm419_vm15, %v416_v53 }
 0x1a8   : > { %v396_v54 = vpop.f32.mrf.mxu2 }
 0x1a9   : > { %v417_v55 = vsel %vm1013_vm7, -1.0, %v396_v54 }
 0x1aa   : > { %422 = vst.msk [vmem:[%s197_s9 + $0x10] sm:$0xff] %vm419_vm15, %v417_v55 }
 0x1b0   : > { %v399_v56 = vpop.f32.mrf.mxu2 }
 0x1b1   : > { %v418_v57 = vsel %vm1013_vm7, -1.0, %v399_v56 }
 0x1b2   : > { %423 = vst.msk [vmem:[%s197_s9 + $0x18] sm:$0xff] %vm419_vm15, %v418_v57 }
 0x1b3   : > { %753 = shalt.err (!%p750_p5)
}
 0x1b4   : > { %s830_s15 = smov 128   ;;  %s831_s19 = smov 8  }
 0x1b5   : > { %571 = dma.vmem_to_hbm [thread:$0]  (%p925_p9), %s439_s6, 512, %s441_s28, %s425_s22, %s830_s15, %s830_s15, %s831_s19  }
 0x1b6 PF: > { %p590_p6 = scmp.ge.s32.totalorder %s822_s27, 2  ;;  %s455_s20 = sand.u32 1, %s798_s23  }
 0x1b7   : > { %s456_s26 = scalar_lea.sflag [#allocation7], %s455_s20 }
 0x1b8   : > { %p584_p7 = pnand %p590_p6, %p932_p11 }
 0x1ba   : > { %p585_p8 = pneg %p584_p7 }
 0x1bc   : > { %793 = dma.done.wait (%p585_p8), %s456_s26, 512  }
 0x1bd   : > { %795 = vsyncadd (%p585_p8), %s456_s26, 4294966784  ;;  %s1104_s9 = sld [smem:[#allocation18_spill]]  ;;  %p31_p9 = scmp.ge.s32.totalorder %s900_s29, 8  }
 0x1be   : > { %s1105_s26 = sld [smem:[#allocation19_spill]]  ;;  %s1106_s23 = smov %s802_s0 }
 0x1bf   : > { %s1107_s0 = smov %s806_s24  ;;  %s1108_s24 = smov %s939_s17 }
 0x1c0   : > { %s1109_s1 = smov %s814_s25  ;;  %s1111_s27 = smov %s900_s29 }
 0x1c1   :  { %33 = sbr.rel (!%p31_p9) target bundleno = 16 (0x10), region = 78 }
 0x1c3   : > { %s1110_s25 = smov %s1104_s9 }
 0x1c6   :  { %462 = vsyncpa [#allocation6], 1 }
 0x1c7   :  { %464 = vsyncpa [#allocation6 + $0x1], 1 }
 0x1c8   :  { %465 = vsyncpa [#allocation7], 1 }
 0x1c9   :  { %467 = vsyncpa [#allocation7 + $0x1], 1 }
 0x1ca   :  { %468 = vsyncpa [#allocation8], 1 }
 0x1cb   :  { %470 = vsyncpa [#allocation8 + $0x1], 1 }

</bundles_post_ra>
